<compile_context>
chip_gen: v7x
topology: tpu7x:2x2x1
jax: 0.10.0
libtpu: 0.0.40
codegen_flags: <defaults>
</compile_context>

<pallas_src>
import functools
import math

import jax
import jax.numpy as jnp
from jax.experimental import pallas as pl
from jax.experimental.pallas import tpu as pltpu

HIDDEN = 256  # fixed by the module definition


def _round_up(n, m):
    return ((n + m - 1) // m) * m


def _cdiv(a, b):
    return (a + b - 1) // b


def _vmem_budget_bytes():
    """~75% of physical VMEM; assume v7x's 64 MiB when the query is unavailable."""
    try:
        cap = int(pltpu.get_tpu_info().vmem_capacity_bytes)
    except Exception:
        cap = 64 << 20
    return (cap * 3) // 4


def _num_tensorcores():
    """2 TensorCores on megacore chips (v4 / v5p / v7x), else 1."""
    try:
        kind = jax.devices()[0].device_kind.lower()
    except Exception:
        return 1
    if "v5e" in kind or "lite" in kind or "v6" in kind:
        return 1
    if "v7" in kind or "v4" in kind or "v5p" in kind:
        return 2
    return 1


# --------------------------------------------------------------------------- #
# Kernels
# --------------------------------------------------------------------------- #
def _mlp_fullk_kernel(x_ref, w1_ref, b1_ref, w2_ref, b2_ref, out_ref):
    """Full feature dim resident: one dot per batch tile, no scratch needed."""
    xb = x_ref[...].astype(w1_ref.dtype)                      # in-kernel cast
    acc = jnp.dot(xb, w1_ref[...], preferred_element_type=jnp.float32)
    h = jnp.maximum(acc + b1_ref[...], 0.0)                   # (tile_b, 256)
    # 256 -> 1 projection as elementwise mul + cross-lane reduce (VPU/XLU,
    # keeps the MXU free); then sigmoid on the EUP.
    z = jnp.sum(h * w2_ref[...], axis=-1) + b2_ref[0, 0]      # (tile_b,)
    out_ref[...] = jax.nn.sigmoid(z).reshape(out_ref.shape).astype(out_ref.dtype)


def _mlp_ksplit_kernel(x_ref, w1_ref, b1_ref, w2_ref, b2_ref, out_ref, acc_ref,
                       *, d_total, tile_k):
    """Large-D fallback: reduce over K tiles, f32 accumulator resident in VMEM."""
    k = pl.program_id(1)
    xb = x_ref[...]
    w1b = w1_ref[...]
    if d_total % tile_k != 0:
        # Mask the K overhang of the last tile (overhang reads are unspecified).
        rem = d_total - k * tile_k
        lane = jax.lax.broadcasted_iota(jnp.int32, (1, tile_k), 1)
        xb = jnp.where(lane < rem, xb, 0.0)
        sub = jax.lax.broadcasted_iota(jnp.int32, (tile_k, 1), 0)
        w1b = jnp.where(sub < rem, w1b, 0.0)
    part = jnp.dot(xb.astype(w1_ref.dtype), w1b,
                   preferred_element_type=jnp.float32)

    @pl.when(k == 0)
    def _():
        acc_ref[...] = part            # first tile: plain store (no zero-init pass)

    @pl.when(k > 0)
    def _():
        acc_ref[...] += part

    @pl.when(k == pl.num_programs(1) - 1)
    def _():
        h = jnp.maximum(acc_ref[...] + b1_ref[...], 0.0)
        z = jnp.sum(h * w2_ref[...], axis=-1) + b2_ref[0, 0]
        out_ref[...] = jax.nn.sigmoid(z).reshape(out_ref.shape).astype(out_ref.dtype)


# --------------------------------------------------------------------------- #
# Wrapper
# --------------------------------------------------------------------------- #
def image_discriminator_forward(x, w1, b1, w2, b2, *, compute_dtype=jnp.bfloat16,
                                _force_tile_b=None, _force_tile_k=None):
    """Returns (output, loss) exactly like ImageDiscriminator.forward.

    x : [B, D] float (any B, any dtype; streamed natively, cast in-kernel)
    w1: [D, 256]; b1: [256]/[1,256]; w2: [256,1]/[1,256]/[256]; b2 scalar-ish.
    loss is None (no pretrained DeepSVDD center available).
    """
    B, D = x.shape
    assert w1.shape == (D, HIDDEN), w1.shape
    out_dtype = x.dtype

    x_bytes = jnp.dtype(x.dtype).itemsize
    c_bytes = jnp.dtype(compute_dtype).itemsize
    o_bytes = jnp.dtype(out_dtype).itemsize
    budget = _vmem_budget_bytes()

    def resident_bytes(tb, tk, with_acc):
        return (2 * tb * tk * x_bytes            # x tile, double-buffered, native dtype
                + 2 * tk * HIDDEN * c_bytes      # W1 tile (conservative x2)
                + 2 * tb * HIDDEN * 4            # f32 dot / hidden intermediates
                + (tb * HIDDEN * 4 if with_acc else 0)
                + 4 * HIDDEN * 4                 # b1, w2 rows
                + 2 * tb * o_bytes)              # lane-dense output tile

    # ---- batch (M) tile: big enough to amortize per-step overhead, never
    # larger than the 128-rounded batch, shrunk until the full-K plan fits.
    if _force_tile_b is not None:
        tile_b = int(_force_tile_b)
    else:
        b_cap = _round_up(B, 128)
        target = _round_up(max((4 << 20) // max(1, D * x_bytes), 1), 128)
        tile_b = int(min(max(128, min(target, 2048)), b_cap))
        while tile_b > 128 and resident_bytes(tile_b, D, False) > budget:
            tile_b -= 128

    # ---- feature (K) tiling: keep W1 fully resident whenever it fits; only
    # split K (and re-stream W1 per batch tile) for very large D.
    if _force_tile_k is not None:
        tile_k = int(_force_tile_k)
    elif resident_bytes(tile_b, D, False) <= budget:
        tile_k = D
    else:
        per_k = 2 * tile_b * x_bytes + 2 * HIDDEN * c_bytes
        fixed = resident_bytes(tile_b, 0, True)
        tile_k = max(128, ((budget - fixed) // max(1, per_k)) // 128 * 128)
        tile_k = min(tile_k, _round_up(D, 128))
    num_k = _cdiv(D, tile_k)
    if num_k == 1:
        tile_k = D
    num_b = _cdiv(B, tile_b)

    # ---- megacore: only split a lone batch tile when there really are 2 TCs
    # and the per-tile x slab is big enough to be worth the extra grid step.
    if (_force_tile_b is None and _num_tensorcores() > 1 and num_b == 1
            and tile_b >= 256 and tile_b * D * x_bytes >= (2 << 20)):
        tile_b = max(128, _round_up(tile_b // 2, 128))
        num_b = _cdiv(B, tile_b)

    # ---- params: small one-time casts/reshapes (no pass over x).
    w1c = w1.astype(compute_dtype)
    b1r = jnp.asarray(b1, jnp.float32).reshape(1, HIDDEN)
    w2r = jnp.asarray(w2, jnp.float32).reshape(1, HIDDEN)   # row form for VPU path
    b2r = jnp.asarray(b2, jnp.float32).reshape(1, 1)         # SMEM scalar

    # ---- VMEM limit: generation-aware cap, with headroom over the estimate.
    est = resident_bytes(tile_b, tile_k, num_k > 1)
    vmem_limit = int(min(budget, max(2 * est, 16 << 20)))

    # ---- scheduler hint (W1 is re-streamed per batch tile only when K-split).
    d_span = num_k * tile_k
    w1_stream = (D * HIDDEN * c_bytes if num_k == 1
                 else num_b * d_span * HIDDEN * c_bytes)
    cost = pl.CostEstimate(
        flops=2 * num_b * tile_b * d_span * HIDDEN + 4 * num_b * tile_b * HIDDEN,
        transcendentals=num_b * tile_b,
        bytes_accessed=int(B * D * x_bytes + w1_stream
                           + num_b * tile_b * o_bytes + 2 * HIDDEN * 4 + 4),
    )

    out_shape = jax.ShapeDtypeStruct((num_b, tile_b), out_dtype)

    if num_k == 1:
        out2d = pl.pallas_call(
            _mlp_fullk_kernel,
            out_shape=out_shape,
            grid_spec=pltpu.PrefetchScalarGridSpec(
                num_scalar_prefetch=0,
                grid=(num_b,),
                in_specs=[
                    pl.BlockSpec((tile_b, D), lambda i: (i, 0)),        # x tile
                    pl.BlockSpec((D, HIDDEN), lambda i: (0, 0)),        # W1 (resident)
                    pl.BlockSpec((1, HIDDEN), lambda i: (0, 0)),        # b1 row
                    pl.BlockSpec((1, HIDDEN), lambda i: (0, 0)),        # w2 row
                    pl.BlockSpec(memory_space=pltpu.MemorySpace.SMEM),  # b2 scalar
                ],
                out_specs=pl.BlockSpec((1, tile_b), lambda i: (i, 0)),  # lane-dense
            ),
            compiler_params=pltpu.CompilerParams(
                dimension_semantics=("parallel",),
                vmem_limit_bytes=vmem_limit),
            cost_estimate=cost,
        )(x, w1c, b1r, w2r, b2r)
    else:
        kern = functools.partial(_mlp_ksplit_kernel, d_total=D, tile_k=tile_k)
        out2d = pl.pallas_call(
            kern,
            out_shape=out_shape,
            grid_spec=pltpu.PrefetchScalarGridSpec(
                num_scalar_prefetch=0,
                grid=(num_b, num_k),
                in_specs=[
                    pl.BlockSpec((tile_b, tile_k), lambda i, k: (i, k)),
                    pl.BlockSpec((tile_k, HIDDEN), lambda i, k: (k, 0)),
                    pl.BlockSpec((1, HIDDEN), lambda i, k: (0, 0)),
                    pl.BlockSpec((1, HIDDEN), lambda i, k: (0, 0)),
                    pl.BlockSpec(memory_space=pltpu.MemorySpace.SMEM),
                ],
                out_specs=pl.BlockSpec((1, tile_b), lambda i, k: (i, 0)),
                scratch_shapes=[pltpu.VMEM((tile_b, HIDDEN), jnp.float32)],
            ),
            compiler_params=pltpu.CompilerParams(
                dimension_semantics=("parallel", "arbitrary"),
                vmem_limit_bytes=vmem_limit),
            cost_estimate=cost,
        )(x, w1c, b1r, w2r, b2r)

    out = out2d.reshape(num_b * tile_b, 1)[:B]

    # TODO(synk): DeepSVDDLoss branch only activates when a pretrained center
    # `c` is loaded from a checkpoint; without it the module returns loss=None.
    loss = None
    return out, loss


def init_params(key, input_dim):
    """Deterministic init matching torch.nn.Linear default (uniform +/- 1/sqrt(fan_in))."""
    k1, k2, k3, k4 = jax.random.split(key, 4)
    bound1 = 1.0 / math.sqrt(input_dim)
    bound2 = 1.0 / math.sqrt(HIDDEN)
    w1 = jax.random.uniform(k1, (input_dim, HIDDEN), jnp.float32, -bound1, bound1)
    b1 = jax.random.uniform(k2, (1, HIDDEN), jnp.float32, -bound1, bound1)
    w2 = jax.random.uniform(k3, (HIDDEN, 1), jnp.float32, -bound2, bound2)
    b2 = jax.random.uniform(k4, (1, 1), jnp.float32, -bound2, bound2)
    return w1, b1, w2, b2


if __name__ == "__main__":
    key = jax.random.PRNGKey(0)
    k_x1, k_x2, k_x3, k_p1, k_p2 = jax.random.split(key, 5)

    def reference(x, w1, b1, w2, b2):
        # Same precision plan as the kernel: bf16 MXU inputs, f32 accumulation,
        # f32 second layer (mul + reduce), f32 sigmoid.
        h = jnp.dot(x.astype(jnp.bfloat16), w1.astype(jnp.bfloat16),
                    preferred_element_type=jnp.float32) + jnp.reshape(b1, (1, HIDDEN))
        h = jnp.maximum(h, 0.0)
        z = jnp.sum(h * jnp.reshape(w2, (1, HIDDEN)), axis=-1, keepdims=True)
        z = z + jnp.reshape(b2, (1, 1))
        return jax.nn.sigmoid(z)

    D1 = 32
    w1, b1, w2, b2 = init_params(k_p1, D1)

    # Case 1: tiny batch -> single 128-row tile, full-K resident W1.
    x1 = jax.random.normal(k_x1, (8, D1), jnp.float32)
    out1, loss1 = image_discriminator_forward(x1, w1, b1, w2, b2)
    out1 = jax.block_until_ready(out1)
    assert out1.shape == (8, 1) and loss1 is None
    assert jnp.allclose(out1, reference(x1, w1, b1, w2, b2), atol=2e-3)

    # Case 2: ragged batch -> one 384-row tile with batch overhang sliced off.
    x2 = jax.random.normal(k_x2, (300, D1), jnp.float32)
    out2, _ = image_discriminator_forward(x2, w1, b1, w2, b2)
    out2 = jax.block_until_ready(out2)
    assert out2.shape == (300, 1)
    assert jnp.allclose(out2, reference(x2, w1, b1, w2, b2), atol=2e-3)

    # Case 3: same input, forced small batch tile -> multi-tile lane-dense
    # output path (num_b = 3) as used for large production batches.
    out2b, _ = image_discriminator_forward(x2, w1, b1, w2, b2, _force_tile_b=128)
    out2b = jax.block_until_ready(out2b)
    assert out2b.shape == (300, 1)
    assert jnp.allclose(out2b, reference(x2, w1, b1, w2, b2), atol=2e-3)

    # Case 4: forced K-split exercises the accumulator kernel and the masked
    # K overhang (D=384 split into a 256 tile + a 128-valid overhang tile).
    D3 = 384
    w1c_, b1c_, w2c_, b2c_ = init_params(k_p2, D3)
    x3 = jax.random.normal(k_x3, (64, D3), jnp.float32)
    out3, _ = image_discriminator_forward(x3, w1c_, b1c_, w2c_, b2c_,
                                          _force_tile_k=256)
    out3 = jax.block_until_ready(out3)
    assert out3.shape == (64, 1)
    assert jnp.allclose(out3, reference(x3, w1c_, b1c_, w2c_, b2c_), atol=2e-3)

    print("KERNEL_OK")
</pallas_src>

<mosaic_0001>
module attributes {stable_mosaic.version = 11 : i64} {
  func.func @_mlp_fullk_kernel(%arg0: i32, %arg1: memref<128x32xf32, #tpu.memory_space<vmem>>, %arg2: memref<32x256xbf16, #tpu.memory_space<vmem>>, %arg3: memref<1x256xf32, #tpu.memory_space<vmem>>, %arg4: memref<1x256xf32, #tpu.memory_space<vmem>>, %arg5: memref<1x1xf32, #tpu.memory_space<smem>>, %arg6: memref<1x128xf32, #tpu.memory_space<vmem>>) attributes {dimension_semantics = [#tpu.dimension_semantics<parallel>], iteration_bounds = array<i64: 1>, scalar_prefetch = 0 : i64, scratch_operands = 0 : i64, tpu.core_type = #tpu.core_type<tc>, window_params = [{transform_indices = @transform_0, window_bounds = array<i64: 128, 32>}, {pipeline_mode = #tpu.pipeline_mode<synchronous>, transform_indices = @transform_1, window_bounds = array<i64: 32, 256>}, {pipeline_mode = #tpu.pipeline_mode<synchronous>, transform_indices = @transform_2, window_bounds = array<i64: 1, 256>}, {pipeline_mode = #tpu.pipeline_mode<synchronous>, transform_indices = @transform_3, window_bounds = array<i64: 1, 256>}, {transform_indices = @transform_4, window_bounds = array<i64: 1, 1>}, {transform_indices = @transform_5, window_bounds = array<i64: 1, 128>}]} {
    %c0 = arith.constant 0 : index
    %c0_0 = arith.constant 0 : index
    %0 = vector.load %arg1[%c0, %c0_0] : memref<128x32xf32, #tpu.memory_space<vmem>>, vector<128x32xf32>
    %1 = arith.truncf %0 : vector<128x32xf32> to vector<128x32xbf16>
    %c0_1 = arith.constant 0 : index
    %c0_2 = arith.constant 0 : index
    %2 = vector.load %arg2[%c0_1, %c0_2] : memref<32x256xbf16, #tpu.memory_space<vmem>>, vector<32x256xbf16>
    %cst = arith.constant dense<0.000000e+00> : vector<128x256xf32>
    %3 = tpu.matmul %1, %2, %cst {dimension_numbers = #tpu.dot_dimension_numbers<[1], [0], [0], [1], [0, 0, 1, 1], [], []>} : vector<128x32xbf16>, vector<32x256xbf16>, vector<128x256xf32> -> vector<128x256xf32>
    %c0_3 = arith.constant 0 : index
    %c0_4 = arith.constant 0 : index
    %4 = vector.load %arg3[%c0_3, %c0_4] : memref<1x256xf32, #tpu.memory_space<vmem>>, vector<1x256xf32>
    %5 = vector.broadcast %4 : vector<1x256xf32> to vector<128x256xf32>
    %6 = arith.addf %3, %5 : vector<128x256xf32>
    %cst_5 = arith.constant 0.000000e+00 : f32
    %7 = vector.broadcast %cst_5 : f32 to vector<128x256xf32>
    %8 = arith.maximumf %6, %7 : vector<128x256xf32>
    %c0_6 = arith.constant 0 : index
    %c0_7 = arith.constant 0 : index
    %9 = vector.load %arg4[%c0_6, %c0_7] : memref<1x256xf32, #tpu.memory_space<vmem>>, vector<1x256xf32>
    %10 = vector.broadcast %9 : vector<1x256xf32> to vector<128x256xf32>
    %11 = arith.mulf %8, %10 : vector<128x256xf32>
    %cst_8 = arith.constant dense<0.000000e+00> : vector<128xf32>
    %12 = vector.multi_reduction <add>, %11, %cst_8 [1] : vector<128x256xf32> to vector<128xf32>
    %c0_9 = arith.constant 0 : index
    %c0_10 = arith.constant 0 : index
    %13 = memref.load %arg5[%c0_9, %c0_10] : memref<1x1xf32, #tpu.memory_space<smem>>
    %14 = vector.broadcast %13 : f32 to vector<128xf32>
    %15 = arith.addf %12, %14 : vector<128xf32>
    %16 = arith.negf %15 : vector<128xf32>
    %17 = math.exp %16 : vector<128xf32>
    %cst_11 = arith.constant 1.000000e+00 : f32
    %18 = vector.broadcast %cst_11 : f32 to vector<128xf32>
    %19 = arith.addf %18, %17 : vector<128xf32>
    %20 = arith.divf %18, %19 : vector<128xf32>
    %21 = vector.shape_cast %20 : vector<128xf32> to vector<1x128xf32>
    %c0_12 = arith.constant 0 : index
    %c0_13 = arith.constant 0 : index
    %22 = vector.load %arg6[%c0_12, %c0_13] : memref<1x128xf32, #tpu.memory_space<vmem>>, vector<1x128xf32>
    tpu.vector_store %arg6[%c0_12, %c0_13], %21 {strides = array<i32>} : memref<1x128xf32, #tpu.memory_space<vmem>>, vector<1x128xf32>,
    return
  }
  func.func @transform_0(%arg0: i32) -> (i32, i32) {
    %c0_i32 = arith.constant 0 : i32
    %c0_i32_0 = arith.constant 0 : i32
    return %arg0, %c0_i32 : i32, i32
  }
  func.func @transform_1(%arg0: i32) -> (i32, i32) {
    %c0_i32 = arith.constant 0 : i32
    %c0_i32_0 = arith.constant 0 : i32
    %c0_i32_1 = arith.constant 0 : i32
    return %c0_i32, %c0_i32_0 : i32, i32
  }
  func.func @transform_2(%arg0: i32) -> (i32, i32) {
    %c0_i32 = arith.constant 0 : i32
    %c0_i32_0 = arith.constant 0 : i32
    %c0_i32_1 = arith.constant 0 : i32
    return %c0_i32, %c0_i32_0 : i32, i32
  }
  func.func @transform_3(%arg0: i32) -> (i32, i32) {
    %c0_i32 = arith.constant 0 : i32
    %c0_i32_0 = arith.constant 0 : i32
    %c0_i32_1 = arith.constant 0 : i32
    return %c0_i32, %c0_i32_0 : i32, i32
  }
  func.func @transform_4(%arg0: i32) -> (i32, i32) {
    %c0_i32 = arith.constant 0 : i32
    %c0_i32_0 = arith.constant 0 : i32
    %c0_i32_1 = arith.constant 0 : i32
    return %c0_i32, %c0_i32_0 : i32, i32
  }
  func.func @transform_5(%arg0: i32) -> (i32, i32) {
    %c0_i32 = arith.constant 0 : i32
    %c0_i32_0 = arith.constant 0 : i32
    return %arg0, %c0_i32 : i32, i32
  }
}

</mosaic_0001>

<bundles_post_ra>
// kernel: tpu_custom_call.1
= control target key start
LH: loop header
LB: loop body
LE: loop exit
PB: predicated region body
PF: predicated region fallthrough
CT: control target
= control target key end

     0   :  { %11 = vsyncpa [#allocation4], 0  ;;  %s1044_s0 = inlined_call_operand.hbm [shape: f32[8,32], index: 0, kind: input, shape index: {}]   ;;  %s1045_s1 = inlined_call_operand.hbm [shape: bf16[32,256], index: 1, kind: input, shape index: {}]   ;;  %s1046_s2 = inlined_call_operand.vmem [shape: f32[1,256], index: 2, kind: input, shape index: {}]   ;;  %s1047_s3 = inlined_call_operand.vmem [shape: f32[1,256], index: 3, kind: input, shape index: {}]   ;;  %s1048_s4 = inlined_call_operand.<no memory space> [shape: f32[1,1], index: 4, kind: input, shape index: {}]   ;;  %s1049_s5 = inlined_call_operand.hbm [shape: f32[1,128], index: 5, kind: output, shape index: {}]  }
   0x1   :  { %12 = vsyncpa [#allocation7], 0 }
   0x2   :  { %13 = vsyncpa [#allocation5], 0 }
   0x3   :  { %18 = vsyncadd [#allocation4], 1920  ;;  %s812_s18 = smov [#allocation3]   ;;  %s740_s22 = scalar_lea.hbm %s1044_s0, 128 }
   0x4   :  { %s19_s19 = sshll.u32 %s812_s18, 4  ;;  %p741_p0 = scmp.ne.s32.totalorder %s1044_s0, %s740_s22  ;;  %s20_s19 = int_to_ptr.vmem [resolvable:$true] %s19_s19 }
   0x5   :  { %p744_p1 = scmp.lt.u32.totalorder %s740_s22, %s1044_s0 }
   0x7   :  { %p746_p2 = pnand %p744_p1, %p741_p0 }
   0x9   :  { %749 = shalt.err (!%p746_p2)
}
   0xa   :  { %s750_s27 = scalar_lea.vmem %s20_s19, 128  ;;  %s754_s28 = scalar_lea.vmem %s20_s19, 2048 }
   0xb   :  { %p751_p3 = scmp.ne.s32.totalorder %s20_s19, %s750_s27  ;;  %p755_p4 = scmp.lt.s32.totalorder %s20_s19, %s20_s19 }
   0xc   :  { %p756_p5 = scmp.lt.s32.totalorder %s754_s28, %s750_s27 }
   0xe   :  { %p757_p6 = por %p756_p5, %p755_p4 }
  0x10   :  { %p758_p7 = pnand %p757_p6, %p751_p3 }
  0x12   :  { %761 = shalt.err (!%p758_p7)
}
  0x13   :  { %s813_s29 = smov 128   ;;  %s814_s30 = smov 8  }
  0x14   :  { %25 = dma.hbm_to_vmem [thread:$0]  %s1044_s0, 128, %s20_s19, [#allocation4], %s813_s29, %s813_s29, %s814_s30  }
  0x15   :  { %s815_s8 = smov [#allocation6]   ;;  %s762_s12 = scalar_lea.hbm %s1045_s1, 512 }
  0x16   :  { %s31_s9 = sshll.u32 %s815_s8, 4  ;;  %p763_p8 = scmp.ne.s32.totalorder %s1045_s1, %s762_s12  ;;  %s32_s9 = int_to_ptr.vmem [resolvable:$true] %s31_s9 }
  0x17   :  { %p766_p9 = scmp.lt.u32.totalorder %s762_s12, %s1045_s1 }
  0x19   :  { %p768_p10 = pnand %p766_p9, %p763_p8 }
  0x1b   :  { %771 = shalt.err (!%p768_p10)
}
  0x1c   :  { %s772_s17 = scalar_lea.vmem %s32_s9, 512  ;;  %p777_p12 = scmp.lt.s32.totalorder %s32_s9, %s32_s9 }
  0x1d   :  { %p773_p11 = scmp.ne.s32.totalorder %s32_s9, %s772_s17  ;;  %p778_p13 = scmp.lt.s32.totalorder %s772_s17, %s772_s17 }
  0x1f   :  { %p779_p0 = por %p778_p13, %p777_p12 }
  0x21   :  { %p780_p1 = pnand %p779_p0, %p773_p11 }
  0x23   :  { %783 = shalt.err (!%p780_p1)
}
  0x24   :  { %37 = dma.hbm_to_vmem [thread:$0]  %s1045_s1, 512, %s32_s9, [#allocation7], %s813_s29, %s813_s29, %s814_s30  }
  0x25   :  { %806 = dma.done.wait [#allocation4], 2048  }
  0x26   :  { %807 = vsyncadd [#allocation4], 4294965248 }
  0x27   :  { %808 = dma.done.wait [#allocation7], 512  }
  0x28   :  { %809 = vsyncadd [#allocation7], 4294966784  ;;  %v816_v0 = vmov 0   ;;  %v670_v1 = vld [vmem:[#allocation6 + $0x4] ss:$8 sps:$4 sm:$0xff]   ;;  %vm111_vm0 = vcmask 261120   ;;  %v81_v29 = vlaneseq }
  0x29   :  { %168 = vmatprep.mubr.bf16.mxu0 %v816_v0  ;;  %208 = vmatprep.mubr.bf16.mxu1 %v816_v0  ;;  %v672_v2 = vld [vmem:[#allocation6] ss:$8 sps:$4 sm:$0xff]   ;;  %v673_v3 = vld [vmem:[#allocation6 + $0x14] ss:$8 sps:$4 sm:$0xff]   ;;  %v675_v4 = vld [vmem:[#allocation6 + $0x10] ss:$8 sps:$4 sm:$0xff]  }
  0x2a   :  { %136 = vmatprep.subr.bf16.mxu0 %v670_v1  ;;  %660 = vmatprep.subr.bf16.mxu1 %v670_v1  ;;  %v51_v5 = vld [vmem:[#allocation3] sm:$0xff]  ;;  %v52_v6 = vld [vmem:[#allocation3 + $0x8] sm:$0xff]  ;;  %v53_v11 = vld [vmem:[#allocation3 + $0x10] sm:$0xff]  ;;  %v881_v30 = vshrl.u32 %v81_v29, 7  ;;  %vm514_vm1 = vcmask 130112   ;;  %vm521_vm2 = vcmask 195712  }
  0x2b   :  { %137 = vmatpush1.bf16.msra.mxu0 %v672_v2  ;;  %662 = vmatpush1.bf16.msra.mxu1 %v672_v2  ;;  %v59_v7 = vld [vmem:[#allocation3 + $0x40] sm:$0xff]  ;;  %v60_v8 = vld [vmem:[#allocation3 + $0x48] sm:$0xff]  ;;  %v67_v9 = vpack.c.bf16 %v52_v6, %v51_v5  ;;  %v54_v12 = vld [vmem:[#allocation3 + $0x18] sm:$0xff]  ;;  %vm528_vm3 = vcmask 261312   ;;  %vm535_vm4 = vcmask 326912   ;;  %vm542_vm5 = vcmask 392512  }
  0x2c   :  { %138 = vmatprep.subr.bf16.mxu0 %v673_v3  ;;  %661 = vmatprep.subr.bf16.mxu1 %v673_v3  ;;  %v71_v10 = vpack.c.bf16 %v60_v8, %v59_v7  ;;  %v61_v13 = vld [vmem:[#allocation3 + $0x50] sm:$0xff]  ;;  %v62_v14 = vld [vmem:[#allocation3 + $0x58] sm:$0xff]  ;;  %v68_v15 = vpack.c.bf16 %v54_v12, %v53_v11  ;;  %v55_v17 = vld [vmem:[#allocation3 + $0x20] sm:$0xff]  ;;  %v83_v31 = vsub.s32 0, %v881_v30  ;;  %v87_v33 = vsub.s32 1, %v881_v30 }
  0x2d   :  { %v72_v16 = vpack.c.bf16 %v62_v14, %v61_v13  ;;  %v56_v18 = vld [vmem:[#allocation3 + $0x28] sm:$0xff]  ;;  %v63_v19 = vld [vmem:[#allocation3 + $0x60] sm:$0xff]  ;;  %v57_v23 = vld [vmem:[#allocation3 + $0x30] sm:$0xff]  ;;  %vm549_vm6 = vcmask 458112   ;;  %vm556_vm7 = vcmask 523712   ;;  %vm563_vm8 = vcmask 589312  }
  0x2e   :  { %v64_v20 = vld [vmem:[#allocation3 + $0x68] sm:$0xff]  ;;  %v69_v21 = vpack.c.bf16 %v56_v18, %v55_v17  ;;  %v58_v24 = vld [vmem:[#allocation3 + $0x38] sm:$0xff]  ;;  %v65_v25 = vld [vmem:[#allocation3 + $0x70] sm:$0xff]  ;;  %vm570_vm9 = vcmask 654912   ;;  %vm577_vm10 = vcmask 720512   ;;  %vm584_vm11 = vcmask 786112  }
  0x2f   :  { %139 = vmatpush1.bf16.msra.mxu0 %v675_v4  ;;  %663 = vmatpush1.bf16.msra.mxu1 %v675_v4  ;;  %v73_v22 = vpack.c.bf16 %v64_v20, %v63_v19  ;;  %v66_v26 = vld [vmem:[#allocation3 + $0x78] sm:$0xff]  ;;  %v70_v27 = vpack.c.bf16 %v58_v24, %v57_v23  ;;  %v79_v32 = vld [vmem:[%s1046_s2] sm:$0x3]  ;;  %vm591_vm12 = vcmask 851712   ;;  %vm598_vm13 = vcmask 917312  }
  0x30   :  { %v74_v28 = vpack.c.bf16 %v66_v26, %v65_v25  ;;  %v888_v34 = vrot.slane %v79_v32, %v83_v31  ;;  %v890_v35 = vrot.slane %v79_v32, %v87_v33  ;;  %v281_v36 = vld [vmem:[%s1047_s3] sm:$0x3]  ;;  %vm605_vm14 = vcmask 982912  }
  0x31   :  { %v897_v42 = vrot.slane %v281_v36, %v83_v31  ;;  %v901_v47 = vrot.slane %v281_v36, %v87_v33  ;;  %vm612_vm15 = vcmask 1048512  }
  0x32   :  { %636 = vmatmul.mubr.msk.bf16.vlgmr.msra.gmra.mrb[0].mxu0 %vm111_vm0, %v67_v9  ;;  %640 = vmatmul.mubr.msk.bf16.vlgmr.msra.gmra.mrb[0].mxu1 %vm111_vm0, %v71_v10 }
  0x33   :  { %178 = vmatprep.mubr.bf16.mxu0 %v816_v0  ;;  %218 = vmatprep.mubr.bf16.mxu1 %v816_v0 }
  0x3a   :  { %637 = vmatmul.mubr.msk.bf16.gmra.mrb[4].mxu0 %vm111_vm0, %v68_v15  ;;  %641 = vmatmul.mubr.msk.bf16.gmra.mrb[4].mxu1 %vm111_vm0, %v72_v16 }
  0x3b   :  { %188 = vmatprep.mubr.bf16.mxu0 %v816_v0  ;;  %228 = vmatprep.mubr.bf16.mxu1 %v816_v0 }
  0x42   :  { %638 = vmatmul.mubr.msk.bf16.gmra.mrb[8].mxu0 %vm111_vm0, %v69_v21  ;;  %642 = vmatmul.mubr.msk.bf16.gmra.mrb[8].mxu1 %vm111_vm0, %v73_v22 }
  0x43   :  { %198 = vmatprep.mubr.bf16.mxu0 %v816_v0  ;;  %238 = vmatprep.mubr.bf16.mxu1 %v816_v0 }
  0x4a   :  { %639 = vmatmul.mubr.msk.bf16.gmra.mrb[12].mxu0 %vm111_vm0, %v70_v27  ;;  %643 = vmatmul.mubr.msk.bf16.gmra.mrb[12].mxu1 %vm111_vm0, %v74_v28 }
 0x105   :  { %v170_v37 = vpop.f32.mrb[0].mxu0  ;;  %v210_v38 = vpop.f32.mrb[0].mxu1 }
 0x106   :  { %v171_v39 = vadd.f32 %v170_v37, %v888_v34  ;;  %v172_v40 = vpop.f32.mrb[1].mxu0  ;;  %v211_v41 = vadd.f32 %v210_v38, %v888_v34  ;;  %v212_v43 = vpop.f32.mrb[1].mxu1 }
 0x107   :  { %v173_v44 = vadd.f32 %v172_v40, %v890_v35  ;;  %v174_v45 = vpop.f32.mrb[2].mxu0  ;;  %v213_v46 = vadd.f32 %v212_v43, %v890_v35  ;;  %v214_v48 = vpop.f32.mrb[2].mxu1 }
 0x108   :  { %v249_v49 = vmax.f32 %v171_v39, 0.0  ;;  %v265_v50 = vmax.f32 %v211_v41, 0.0  ;;  %v175_v51 = vadd.f32 %v174_v45, %v888_v34  ;;  %v176_v52 = vpop.f32.mrb[3].mxu0  ;;  %v215_v53 = vadd.f32 %v214_v48, %v888_v34  ;;  %v216_v54 = vpop.f32.mrb[3].mxu1 }
 0x109   :  { %v250_v55 = vmax.f32 %v173_v44, 0.0  ;;  %v266_v56 = vmax.f32 %v213_v46, 0.0  ;;  %v177_v57 = vadd.f32 %v176_v52, %v890_v35  ;;  %v217_v58 = vadd.f32 %v216_v54, %v890_v35 }
 0x10a   :  { %v309_v59 = vmul.f32 %v897_v42, %v265_v50  ;;  %v251_v60 = vmax.f32 %v175_v51, 0.0  ;;  %v267_v61 = vmax.f32 %v215_v53, 0.0  ;;  %v293_v62 = vmul.f32 %v897_v42, %v249_v49 }
 0x10b   :  { %v310_v63 = vmul.f32 %v901_v47, %v266_v56  ;;  %v252_v0 = vmax.f32 %v177_v57, 0.0  ;;  %v268_v1 = vmax.f32 %v217_v58, 0.0  ;;  %v294_v2 = vmul.f32 %v901_v47, %v250_v55 }
 0x10c   :  { %v295_v3 = vmul.f32 %v897_v42, %v251_v60  ;;  %v311_v4 = vmul.f32 %v897_v42, %v267_v61 }
 0x10d   :  { %v296_v5 = vmul.f32 %v901_v47, %v252_v0  ;;  %v180_v6 = vpop.f32.mrb[4].mxu0  ;;  %v325_v7 = vadd.f32 %v294_v2, %v293_v62  ;;  %v220_v8 = vpop.f32.mrb[4].mxu1  ;;  %v312_v9 = vmul.f32 %v901_v47, %v268_v1  ;;  %v349_v10 = vadd.f32 %v310_v63, %v309_v59 }
 0x10e   :  { %v181_v11 = vadd.f32 %v180_v6, %v888_v34  ;;  %v182_v12 = vpop.f32.mrb[5].mxu0  ;;  %v221_v13 = vadd.f32 %v220_v8, %v888_v34  ;;  %v222_v14 = vpop.f32.mrb[5].mxu1 }
 0x10f   :  { %v183_v15 = vadd.f32 %v182_v12, %v890_v35  ;;  %v184_v16 = vpop.f32.mrb[6].mxu0  ;;  %326 = vadd.xlane.f32.xlu0 %v325_v7  ;;  %v223_v17 = vadd.f32 %v222_v14, %v890_v35  ;;  %v352_v18 = vadd.f32 %v312_v9, %v311_v4  ;;  %v224_v19 = vpop.f32.mrb[6].mxu1  ;;  %v328_v20 = vadd.f32 %v296_v5, %v295_v3 }
 0x110   :  { %v253_v21 = vmax.f32 %v181_v11, 0.0  ;;  %v185_v22 = vadd.f32 %v184_v16, %v888_v34  ;;  %v186_v23 = vpop.f32.mrb[7].mxu0  ;;  %v269_v24 = vmax.f32 %v221_v13, 0.0  ;;  %v225_v25 = vadd.f32 %v224_v19, %v888_v34  ;;  %v226_v26 = vpop.f32.mrb[7].mxu1 }
 0x111   :  { %v254_v27 = vmax.f32 %v183_v15, 0.0  ;;  %v187_v28 = vadd.f32 %v186_v23, %v890_v35  ;;  %v270_v31 = vmax.f32 %v223_v17, 0.0  ;;  %353 = vadd.xlane.f32.xlu1 %v352_v18  ;;  %v227_v32 = vadd.f32 %v226_v26, %v890_v35 }
 0x112   :  { %v297_v33 = vmul.f32 %v897_v42, %v253_v21  ;;  %v255_v36 = vmax.f32 %v185_v22, 0.0  ;;  %v313_v37 = vmul.f32 %v897_v42, %v269_v24  ;;  %v271_v38 = vmax.f32 %v225_v25, 0.0 }
 0x113   :  { %v298_v39 = vmul.f32 %v901_v47, %v254_v27  ;;  %v256_v40 = vmax.f32 %v187_v28, 0.0  ;;  %v314_v41 = vmul.f32 %v901_v47, %v270_v31  ;;  %350 = vadd.xlane.f32.xlu0 %v349_v10  ;;  %v272_v43 = vmax.f32 %v227_v32, 0.0 }
 0x114   :  { %v299_v44 = vmul.f32 %v897_v42, %v255_v36  ;;  %v315_v51 = vmul.f32 %v897_v42, %v271_v38 }
 0x115   :  { %v300_v45 = vmul.f32 %v901_v47, %v256_v40  ;;  %v190_v46 = vpop.f32.mrb[8].mxu0  ;;  %v331_v48 = vadd.f32 %v298_v39, %v297_v33  ;;  %v230_v49 = vpop.f32.mrb[8].mxu1  ;;  %v355_v50 = vadd.f32 %v314_v41, %v313_v37  ;;  %v316_v53 = vmul.f32 %v901_v47, %v272_v43 }
 0x116   :  { %v191_v52 = vadd.f32 %v190_v46, %v888_v34  ;;  %v192_v54 = vpop.f32.mrb[9].mxu0  ;;  %v231_v55 = vadd.f32 %v230_v49, %v888_v34  ;;  %v232_v56 = vpop.f32.mrb[9].mxu1 }
 0x117   :  { %v193_v57 = vadd.f32 %v192_v54, %v890_v35  ;;  %v194_v58 = vpop.f32.mrb[10].mxu0  ;;  %332 = vadd.xlane.f32.xlu1 %v331_v48  ;;  %329 = vadd.xlane.f32.xlu0 %v328_v20  ;;  %v233_v59 = vadd.f32 %v232_v56, %v890_v35  ;;  %v334_v60 = vadd.f32 %v300_v45, %v299_v44  ;;  %v234_v61 = vpop.f32.mrb[10].mxu1 }
 0x118   :  { %v257_v62 = vmax.f32 %v191_v52, 0.0  ;;  %v195_v63 = vadd.f32 %v194_v58, %v888_v34  ;;  %v196_v0 = vpop.f32.mrb[11].mxu0  ;;  %v273_v1 = vmax.f32 %v231_v55, 0.0  ;;  %v235_v2 = vadd.f32 %v234_v61, %v888_v34  ;;  %v236_v3 = vpop.f32.mrb[11].mxu1 }
 0x119   :  { %v258_v4 = vmax.f32 %v193_v57, 0.0  ;;  %v197_v5 = vadd.f32 %v196_v0, %v890_v35  ;;  %v274_v6 = vmax.f32 %v233_v59, 0.0  ;;  %v237_v7 = vadd.f32 %v236_v3, %v890_v35 }
 0x11a   :  { %v301_v8 = vmul.f32 %v897_v42, %v257_v62  ;;  %v259_v9 = vmax.f32 %v195_v63, 0.0  ;;  %v317_v10 = vmul.f32 %v897_v42, %v273_v1  ;;  %v275_v11 = vmax.f32 %v235_v2, 0.0 }
 0x11b   :  { %v302_v12 = vmul.f32 %v901_v47, %v258_v4  ;;  %v260_v13 = vmax.f32 %v197_v5, 0.0  ;;  %v318_v14 = vmul.f32 %v901_v47, %v274_v6  ;;  %335 = vadd.xlane.f32.xlu1 %v334_v60  ;;  %356 = vadd.xlane.f32.xlu0 %v355_v50  ;;  %v276_v15 = vmax.f32 %v237_v7, 0.0 }
 0x11c   :  { %v303_v16 = vmul.f32 %v897_v42, %v259_v9  ;;  %v358_v17 = vadd.f32 %v316_v53, %v315_v51  ;;  %v319_v23 = vmul.f32 %v897_v42, %v275_v11  ;;  %v966_v1 = vstv %s1048_s4  ;;  %s817_s4 = smov [#allocation8]  }
 0x11d   :  { %v304_v18 = vmul.f32 %v901_v47, %v260_v13  ;;  %v200_v19 = vpop.f32.mrb[12].mxu0  ;;  %v337_v20 = vadd.f32 %v302_v12, %v301_v8  ;;  %v240_v21 = vpop.f32.mrb[12].mxu1  ;;  %v361_v22 = vadd.f32 %v318_v14, %v317_v10  ;;  %v320_v25 = vmul.f32 %v901_v47, %v276_v15  ;;  %s622_s22 = sshll.u32 %s817_s4, 4  ;;  %s623_s22 = int_to_ptr.vmem [resolvable:$true] %s622_s22 }
 0x11e   :  { %v201_v24 = vadd.f32 %v200_v19, %v888_v34  ;;  %v202_v26 = vpop.f32.mrb[13].mxu0  ;;  %v241_v27 = vadd.f32 %v240_v21, %v888_v34  ;;  %v242_v28 = vpop.f32.mrb[13].mxu1  ;;  %s784_s23 = scalar_lea.vmem %s623_s22, 16  ;;  %s788_s24 = scalar_lea.vmem %s623_s22, 32 }
 0x11f   :  { %v203_v31 = vadd.f32 %v202_v26, %v890_v35  ;;  %v204_v32 = vpop.f32.mrb[14].mxu0  ;;  %359 = vadd.xlane.f32.xlu1 %v358_v17  ;;  %338 = vadd.xlane.f32.xlu0 %v337_v20  ;;  %v243_v33 = vadd.f32 %v242_v28, %v890_v35  ;;  %v340_v36 = vadd.f32 %v304_v18, %v303_v16  ;;  %v244_v37 = vpop.f32.mrb[14].mxu1  ;;  %p785_p2 = scmp.ne.s32.totalorder %s623_s22, %s784_s23  ;;  %p789_p3 = scmp.lt.s32.totalorder %s623_s22, %s623_s22 }
 0x120   :  { %v261_v38 = vmax.f32 %v201_v24, 0.0  ;;  %v205_v39 = vadd.f32 %v204_v32, %v888_v34  ;;  %v206_v40 = vpop.f32.mrb[15].mxu0  ;;  %v277_v41 = vmax.f32 %v241_v27, 0.0  ;;  %v245_v43 = vadd.f32 %v244_v37, %v888_v34  ;;  %v246_v44 = vpop.f32.mrb[15].mxu1  ;;  %p790_p4 = scmp.lt.s32.totalorder %s788_s24, %s784_s23 }
 0x121   :  { %v262_v45 = vmax.f32 %v203_v31, 0.0  ;;  %v207_v46 = vadd.f32 %v206_v40, %v890_v35  ;;  %v278_v48 = vmax.f32 %v243_v33, 0.0  ;;  %v247_v49 = vadd.f32 %v246_v44, %v890_v35 }
 0x122   :  { %v305_v50 = vmul.f32 %v897_v42, %v261_v38  ;;  %v263_v51 = vmax.f32 %v205_v39, 0.0  ;;  %v321_v52 = vmul.f32 %v897_v42, %v277_v41  ;;  %v279_v53 = vmax.f32 %v245_v43, 0.0  ;;  %p791_p5 = por %p790_p4, %p789_p3 }
 0x123   :  { %v306_v54 = vmul.f32 %v901_v47, %v262_v45  ;;  %v264_v55 = vmax.f32 %v207_v46, 0.0  ;;  %v322_v56 = vmul.f32 %v901_v47, %v278_v48  ;;  %341 = vadd.xlane.f32.xlu1 %v340_v36  ;;  %v280_v34 = vmax.f32 %v247_v49, 0.0 }
 0x124   :  { %v307_v57 = vmul.f32 %v897_v42, %v263_v51  ;;  %v323_v58 = vmul.f32 %v897_v42, %v279_v53  ;;  %v364_v59 = vadd.f32 %v320_v25, %v319_v23  ;;  %p792_p6 = pnand %p791_p5, %p785_p2 }
 0x125   :  { %v308_v35 = vmul.f32 %v901_v47, %v264_v55  ;;  %v324_v60 = vmul.f32 %v901_v47, %v280_v34  ;;  %v343_v61 = vadd.f32 %v306_v54, %v305_v50  ;;  %v367_v62 = vadd.f32 %v322_v56, %v321_v52 }
 0x127   :  { %344 = vadd.xlane.f32.xlu0 %v343_v61  ;;  %v346_v63 = vadd.f32 %v308_v35, %v307_v57  ;;  %v370_v0 = vadd.f32 %v324_v60, %v323_v58  ;;  %v984_v35 = vand.u32 127, %v81_v29 }
 0x129   :  { %347 = vadd.xlane.f32.xlu1 %v346_v63 }
 0x12b   :  { %362 = vadd.xlane.f32.xlu0 %v361_v22 }
 0x12d   :  { %365 = vadd.xlane.f32.xlu1 %v364_v59 }
 0x12f   :  { %368 = vadd.xlane.f32.xlu0 %v367_v62 }
 0x131   :  { %371 = vadd.xlane.f32.xlu1 %v370_v0 }
 0x19c   :  { %v327_v42 = vpop.xlane.xlu0 %326 }
 0x19d   :  { %v375_v2 = vadd.f32 %v966_v1, %v327_v42 }
 0x19e   :  { %v354_v3 = vpop.xlane.xlu1 %353 }
 0x19f   :  { %v644_v4 = vmul.f32 -1.442695, %v375_v2  ;;  %v384_v14 = vadd.f32 %v966_v1, %v354_v3  ;;  %v509_v2 = vadd.s32 4294967288, %v984_v35 }
 0x1a0   :  { %v351_v47 = vpop.xlane.xlu0 %350 }
 0x1a1   :  { %676 = vpow2.f32 %v644_v4  ;;  %v383_v16 = vadd.f32 %v966_v1, %v351_v47  ;;  %v653_v20 = vmul.f32 -1.442695, %v384_v14 }
 0x1a3   :  { %v652_v24 = vmul.f32 -1.442695, %v383_v16 }
 0x1a4   :  { %v333_v5 = vpop.xlane.xlu1 %332  ;;  %v330_v6 = vpop.xlane.xlu0 %329 }
 0x1a5   :  { %v377_v7 = vadd.f32 %v966_v1, %v333_v5  ;;  %v376_v8 = vadd.f32 %v966_v1, %v330_v6 }
 0x1a7   :  { %v646_v9 = vmul.f32 -1.442695, %v377_v7  ;;  %v645_v10 = vmul.f32 -1.442695, %v376_v8  ;;  %v989_v7 = vadd.s32 4294967224, %v984_v35 }
 0x1a8   :  { %v336_v11 = vpop.xlane.xlu1 %335  ;;  %v357_v12 = vpop.xlane.xlu0 %356 }
 0x1a9   :  { %v378_v13 = vadd.f32 %v966_v1, %v336_v11  ;;  %678 = vpow2.f32 %v645_v10  ;;  %v385_v22 = vadd.f32 %v966_v1, %v357_v12  ;;  %v507_v10 = vsub.s32 %v984_v35, %v881_v30 }
 0x1aa   :  { %680 = vpow2.f32 %v646_v9  ;;  %v516_v9 = vadd.s32 4294967280, %v984_v35  ;;  %v512_v11 = vsub.s32 %v509_v2, %v881_v30  ;;  %v523_v12 = vadd.s32 4294967272, %v984_v35 }
 0x1ab   :  { %v647_v15 = vmul.f32 -1.442695, %v378_v13  ;;  %v677_v21 = vpop.eup %676  ;;  %v654_v31 = vmul.f32 -1.442695, %v385_v22  ;;  %v600_v2 = vadd.s32 4294967184, %v984_v35 }
 0x1ac   :  { %v360_v17 = vpop.xlane.xlu1 %359  ;;  %v339_v18 = vpop.xlane.xlu0 %338  ;;  %v439_v28 = vadd.f32 1.0, %v677_v21 }
 0x1ad   :  { %682 = vpow2.f32 %v647_v15  ;;  %v379_v19 = vadd.f32 %v966_v1, %v339_v18  ;;  %v386_v25 = vadd.f32 %v966_v1, %v360_v17  ;;  %v997_v15 = vadd.s32 4294967232, %v984_v35 }
 0x1ae   :  { %684 = vpow2.f32 %v653_v20  ;;  %v530_v17 = vadd.s32 4294967264, %v984_v35  ;;  %v537_v20 = vadd.s32 4294967256, %v984_v35 }
 0x1af   :  { %v648_v23 = vmul.f32 -1.442695, %v379_v19  ;;  %v655_v36 = vmul.f32 -1.442695, %v386_v25 }
 0x1b0   :  { %v342_v26 = vpop.xlane.xlu1 %341 }
 0x1b1   :  { %v380_v27 = vadd.f32 %v966_v1, %v342_v26  ;;  %686 = vpow2.f32 %v648_v23  ;;  %v568_v23 = vsub.s32 %v989_v7, %v881_v30 }
 0x1b2   :  { %688 = vpow2.f32 %v652_v24  ;;  %v519_v24 = vsub.s32 %v516_v9, %v881_v30  ;;  %v607_v9 = vadd.s32 4294967176, %v984_v35 }
 0x1b3   :  { %v649_v32 = vmul.f32 -1.442695, %v380_v27  ;;  %v679_v33 = vpop.eup %678  ;;  %v526_v27 = vsub.s32 %v523_v12, %v881_v30 }
 0x1b4   :  { %v345_v37 = vpop.xlane.xlu0 %344  ;;  %v681_v38 = vpop.eup %680  ;;  %v440_v40 = vadd.f32 1.0, %v679_v33  ;;  %v544_v33 = vadd.s32 4294967248, %v984_v35 }
 0x1b5   :  { %690 = vpow2.f32 %v649_v32  ;;  %v381_v39 = vadd.f32 %v966_v1, %v345_v37  ;;  %v441_v46 = vadd.f32 1.0, %v681_v38  ;;  %v533_v32 = vsub.s32 %v530_v17, %v881_v30 }
 0x1b6   :  { %692 = vrcp.f32 %v439_v28  ;;  %v348_v41 = vpop.xlane.xlu1 %347  ;;  %v540_v38 = vsub.s32 %v537_v20, %v881_v30 }
 0x1b7   :  { %v683_v43 = vpop.eup %682  ;;  %694 = vpow2.f32 %v654_v31  ;;  %v650_v44 = vmul.f32 -1.442695, %v381_v39  ;;  %v382_v45 = vadd.f32 %v966_v1, %v348_v41 }
 0x1b8   :  { %696 = vpow2.f32 %v655_v36  ;;  %v363_v48 = vpop.xlane.xlu0 %362  ;;  %v442_v51 = vadd.f32 1.0, %v683_v43  ;;  %v685_v55 = vpop.eup %684  ;;  %v551_v43 = vadd.s32 4294967240, %v984_v35 }
 0x1b9   :  { %698 = vpow2.f32 %v650_v44  ;;  %v651_v49 = vmul.f32 -1.442695, %v382_v45  ;;  %v387_v50 = vadd.f32 %v966_v1, %v363_v48  ;;  %v448_v4 = vadd.f32 1.0, %v685_v55 }
 0x1ba   :  { %700 = vrcp.f32 %v440_v40  ;;  %v366_v52 = vpop.xlane.xlu1 %365 }
 0x1bb   :  { %702 = vpow2.f32 %v651_v49  ;;  %v656_v53 = vmul.f32 -1.442695, %v387_v50  ;;  %v388_v54 = vadd.f32 %v966_v1, %v366_v52  ;;  %v687_v34 = vpop.eup %686  ;;  %v572_v50 = vadd.s32 4294967216, %v984_v35 }
 0x1bc   :  { %704 = vrcp.f32 %v441_v46  ;;  %v369_v56 = vpop.xlane.xlu0 %368  ;;  %v689_v59 = vpop.eup %688  ;;  %v443_v60 = vadd.f32 1.0, %v687_v34  ;;  %v561_v34 = vsub.s32 %v997_v15, %v881_v30 }
 0x1bd   :  { %706 = vpow2.f32 %v656_v53  ;;  %v657_v57 = vmul.f32 -1.442695, %v388_v54  ;;  %v389_v58 = vadd.f32 %v966_v1, %v369_v56  ;;  %v447_v8 = vadd.f32 1.0, %v689_v59 }
 0x1be   :  { %708 = vrcp.f32 %v442_v51  ;;  %v372_v61 = vpop.xlane.xlu1 %371  ;;  %v579_v51 = vadd.s32 4294967208, %v984_v35  ;;  %v547_v53 = vsub.s32 %v544_v33, %v881_v30 }
 0x1bf   :  { %v691_v62 = vpop.eup %690  ;;  %710 = vpow2.f32 %v657_v57  ;;  %v658_v63 = vmul.f32 -1.442695, %v389_v58  ;;  %v390_v0 = vadd.f32 %v966_v1, %v372_v61  ;;  %v554_v58 = vsub.s32 %v551_v43, %v881_v30 }
 0x1c0   :  { %v693_v42 = vpop.eup %692  ;;  %712 = vrcp.f32 %v443_v60  ;;  %v444_v3 = vadd.f32 1.0, %v691_v62  ;;  %v586_v61 = vadd.s32 4294967200, %v984_v35 }
 0x1c1   :  { %v695_v47 = vpop.eup %694  ;;  %714 = vpow2.f32 %v658_v63  ;;  %v659_v5 = vmul.f32 -1.442695, %v390_v0  ;;  %v508_v37 = vrot.slane %v693_v42, %v507_v10  ;;  %v593_v42 = vadd.s32 4294967192, %v984_v35 }
 0x1c2   :  { %v697_v6 = vpop.eup %696  ;;  %716 = vrcp.f32 %v444_v3  ;;  %v449_v16 = vadd.f32 1.0, %v695_v47  ;;  %v575_v47 = vsub.s32 %v572_v50, %v881_v30 }
 0x1c3   :  { %v699_v29 = vpop.eup %698  ;;  %718 = vpow2.f32 %v659_v5  ;;  %v450_v19 = vadd.f32 1.0, %v697_v6  ;;  %v596_v15 = vsub.s32 %v593_v42, %v881_v30 }
 0x1c4   :  { %v701_v1 = vpop.eup %700  ;;  %v445_v13 = vadd.f32 1.0, %v699_v29  ;;  %720 = vrcp.f32 %v448_v4  ;;  %v582_v4 = vsub.s32 %v579_v51, %v881_v30 }
 0x1c5   :  { %v703_v14 = vpop.eup %702  ;;  %v513_v26 = vrot.slane %v701_v1, %v512_v11  ;;  %v589_v11 = vsub.s32 %v586_v61, %v881_v30 }
 0x1c6   :  { %v705_v18 = vpop.eup %704  ;;  %722 = vrcp.f32 %v445_v13  ;;  %v446_v21 = vadd.f32 1.0, %v703_v14 }
 0x1c7   :  { %v707_v22 = vpop.eup %706  ;;  %724 = vrcp.f32 %v447_v8  ;;  %v520_v41 = vrot.slane %v705_v18, %v519_v24  ;;  %v515_v45 = vsel %vm514_vm1, %v513_v26, %v508_v37 }
 0x1c8   :  { %v709_v25 = vpop.eup %708  ;;  %726 = vrcp.f32 %v446_v21  ;;  %v451_v28 = vadd.f32 1.0, %v707_v22  ;;  %v610_v21 = vsub.s32 %v607_v9, %v881_v30 }
 0x1c9   :  { %v711_v31 = vpop.eup %710  ;;  %728 = vrcp.f32 %v449_v16  ;;  %v527_v46 = vrot.slane %v709_v25, %v526_v27  ;;  %v522_v57 = vsel %vm521_vm2, %v520_v41, %v515_v45  ;;  %v603_v16 = vsub.s32 %v600_v2, %v881_v30 }
 0x1ca   :  { %v713_v36 = vpop.eup %712  ;;  %730 = vrcp.f32 %v450_v19  ;;  %v452_v39 = vadd.f32 1.0, %v711_v31 }
 0x1cb   :  { %v715_v40 = vpop.eup %714  ;;  %732 = vrcp.f32 %v451_v28  ;;  %v534_v52 = vrot.slane %v713_v36, %v533_v32  ;;  %v529_v60 = vsel %vm528_vm3, %v527_v46, %v522_v57 }
 0x1cc   :  { %v717_v44 = vpop.eup %716  ;;  %734 = vrcp.f32 %v452_v39  ;;  %v453_v48 = vadd.f32 1.0, %v715_v40 }
 0x1cd   :  { %v719_v49 = vpop.eup %718  ;;  %v541_v54 = vrot.slane %v717_v44, %v540_v38  ;;  %v536_v63 = vsel %vm535_vm4, %v534_v52, %v529_v60 }
 0x1ce   :  { %736 = vrcp.f32 %v453_v48  ;;  %v454_v55 = vadd.f32 1.0, %v719_v49  ;;  %v721_v56 = vpop.eup %720 }
 0x1cf   :  { %v543_v5 = vsel %vm542_vm5, %v541_v54, %v536_v63  ;;  %v569_v13 = vrot.slane %v721_v56, %v568_v23 }
 0x1d0   :  { %v723_v59 = vpop.eup %722  ;;  %738 = vrcp.f32 %v454_v55 }
 0x1d1   :  { %v725_v62 = vpop.eup %724  ;;  %v548_v0 = vrot.slane %v723_v59, %v547_v53 }
 0x1d2   :  { %v727_v3 = vpop.eup %726  ;;  %v562_v10 = vrot.slane %v725_v62, %v561_v34 }
 0x1d3   :  { %v729_v6 = vpop.eup %728  ;;  %v550_v29 = vsel %vm549_vm6, %v548_v0, %v543_v5  ;;  %v555_v8 = vrot.slane %v727_v3, %v554_v58 }
 0x1d4   :  { %v731_v1 = vpop.eup %730  ;;  %v576_v18 = vrot.slane %v729_v6, %v575_v47 }
 0x1d5   :  { %v733_v12 = vpop.eup %732  ;;  %v557_v14 = vsel %vm556_vm7, %v555_v8, %v550_v29  ;;  %v583_v35 = vrot.slane %v731_v1, %v582_v4 }
 0x1d6   :  { %v735_v17 = vpop.eup %734  ;;  %v564_v19 = vsel %vm563_vm8, %v562_v10, %v557_v14  ;;  %v590_v25 = vrot.slane %v733_v12, %v589_v11 }
 0x1d7   :  { %v571_v20 = vsel %vm570_vm9, %v569_v13, %v564_v19  ;;  %v597_v23 = vrot.slane %v735_v17, %v596_v15 }
 0x1d8   :  { %v737_v22 = vpop.eup %736  ;;  %v578_v24 = vsel %vm577_vm10, %v576_v18, %v571_v20 }
 0x1d9   :  { %v585_v7 = vsel %vm584_vm11, %v583_v35, %v578_v24  ;;  %v604_v26 = vrot.slane %v737_v22, %v603_v16 }
 0x1da   :  { %v739_v27 = vpop.eup %738  ;;  %v592_v28 = vsel %vm591_vm12, %v590_v25, %v585_v7 }
 0x1db   :  { %v599_v31 = vsel %vm598_vm13, %v597_v23, %v592_v28  ;;  %v611_v32 = vrot.slane %v739_v27, %v610_v21 }
 0x1dc   :  { %v606_v33 = vsel %vm605_vm14, %v604_v26, %v599_v31 }
 0x1dd   :  { %v613_v36 = vsel %vm612_vm15, %v611_v32, %v606_v33 }
 0x1de   :  { %615 = vst [vmem:[#allocation8] sm:$0x1] %v613_v36 }
 0x1df   :  { %795 = shalt.err (!%p792_p6)
}
 0x1e0   :  { %s796_s27 = scalar_lea.hbm %s1049_s5, 16 }
 0x1e1   :  { %p797_p7 = scmp.ne.s32.totalorder %s1049_s5, %s796_s27  ;;  %p800_p8 = scmp.lt.u32.totalorder %s796_s27, %s1049_s5 }
 0x1e3   :  { %p802_p9 = pnand %p800_p8, %p797_p7 }
 0x1e5   :  { %805 = shalt.err (!%p802_p9)
}
 0x1e6   :  { %625 = dma.vmem_to_hbm [thread:$0]  %s623_s22, 16, %s1049_s5, [#allocation5]  }
 0x1e7   :  { %810 = dma.done.wait [#allocation5], 16  }
 0x1e8   :  { %811 = vsyncadd [#allocation5], 4294967280 }
 0x1e9   :  { %629 = vsyncpa [#allocation4], 1 }
 0x1ea   :  { %630 = vsyncpa [#allocation7], 1 }
 0x1eb   :  { %631 = vsyncpa [#allocation5], 1 }

</bundles_post_ra>
